<compile_context>
chip_gen: v7x
topology: tpu7x:2x2x1
jax: 0.10.0
libtpu: 0.0.40
codegen_flags: <defaults>
</compile_context>

<pallas_src>
import jax
import jax.numpy as jnp
from jax import lax
from jax.experimental import pallas as pl
from jax.experimental.pallas import tpu as pltpu

BN_EPS = 1e-5
# Explicit, generation-safe VMEM budget (v7x: 64 MiB physical / 32 MiB default scoped;
# v5e/v6e: 128 MiB physical). Tiles below stay far under this.
_VMEM_LIMIT_BYTES = 32 * 1024 * 1024


# --------------------------------------------------------------------------------
# Pass 1: full-batch BatchNorm statistics.  h = x @ W1 (bias dropped: the batch-mean
# subtraction cancels it exactly).  Accumulate sum and sum-of-squares over N into
# resident (1, Nh) output accumulators (same output block across the grid axis).
# --------------------------------------------------------------------------------
def _stats_kernel(x_ref, w1_ref, sum_ref, ssq_ref):
    @pl.when(pl.program_id(0) == 0)
    def _():
        sum_ref[...] = jnp.zeros_like(sum_ref)
        ssq_ref[...] = jnp.zeros_like(ssq_ref)

    h = jnp.dot(x_ref[...], w1_ref[...],
                preferred_element_type=jnp.float32)          # (TN, Nh) f32
    sum_ref[...] += jnp.sum(h, axis=0, keepdims=True)        # (1, Nh)
    ssq_ref[...] += jnp.sum(h * h, axis=0, keepdims=True)    # (1, Nh)


# --------------------------------------------------------------------------------
# Pass 2: normalize (fused scale/shift) + ReLU + Linear(Nh->1) + Sigmoid.
# The second layer is a row-vector dot against a^T so the tile result is produced
# (and stored) lane-dense as (1, TN).
# --------------------------------------------------------------------------------
def _apply_kernel(x_ref, w1_ref, scale_ref, shift_ref, w2_ref, b2_ref, out_ref):
    h = jnp.dot(x_ref[...], w1_ref[...],
                preferred_element_type=jnp.float32)          # (TN, Nh) f32
    a = jnp.maximum(h * scale_ref[...] + shift_ref[...], 0.0)  # fused BN + ReLU

    # (1, Nh) @ (Nh, TN) -> (1, TN): N sits on the lane axis at store time.
    y = jnp.dot(w2_ref[...], jnp.transpose(a),
                preferred_element_type=jnp.float32) + b2_ref[0]

    # Sigmoid with EUP reciprocal (exact mode to preserve module numerics).
    out_ref[...] = pl.reciprocal(1.0 + jnp.exp(-y), approx=False)


def _pick_tile(n):
    """Largest lane-aligned row tile that divides N (falls back to one full block)."""
    for tn in (2048, 1024, 512, 256, 128):
        if n % tn == 0:
            return tn
    return n


def nnfbp_forward(x, w1_t, b1, gamma, beta, w2, b2, *, matmul_dtype=None, block_n=None):
    """NNFBP forward (train-mode BatchNorm semantics).

    x: (N, D); w1_t: (D, Nh); b1/gamma/beta: (1, Nh); w2: (Nh, 1); b2: (1, 1).
    matmul_dtype: optional dtype (e.g. jnp.bfloat16) for the dominant x/W1 MXU stream.
    Returns (N,) float32, matching `x.view(x.size(0))` of the PyTorch module.
    """
    del b1  # Train-mode BatchNorm subtracts the batch mean -> b1 cancels exactly.

    N, D = x.shape
    Nh = w1_t.shape[1]

    if matmul_dtype is not None:
        x_mm = x.astype(matmul_dtype)
        w1_mm = w1_t.astype(matmul_dtype)
    else:
        x_mm, w1_mm = x, w1_t

    tn = block_n if block_n is not None else _pick_tile(N)
    assert N % tn == 0, f"block_n={tn} must divide N={N}"
    assert tn == N or tn % 128 == 0, "row tile must be lane-aligned (multiple of 128)"
    grid = (N // tn,)

    # ---------------- Pass 1: batch statistics (sequential/accumulating axis) ----
    hsum, hssq = pl.pallas_call(
        _stats_kernel,
        out_shape=(jax.ShapeDtypeStruct((1, Nh), jnp.float32),
                   jax.ShapeDtypeStruct((1, Nh), jnp.float32)),
        grid=grid,
        in_specs=[
            pl.BlockSpec((tn, D), lambda i: (i, 0)),
            pl.BlockSpec((D, Nh), lambda i: (0, 0)),
        ],
        out_specs=(pl.BlockSpec((1, Nh), lambda i: (0, 0)),
                   pl.BlockSpec((1, Nh), lambda i: (0, 0))),
        compiler_params=pltpu.CompilerParams(
            dimension_semantics=("arbitrary",),
            vmem_limit_bytes=_VMEM_LIMIT_BYTES),
    )(x_mm, w1_mm)

    # Tiny O(Nh) math stays in XLA: fold mean / biased var / gamma / beta into a single
    # per-feature scale and shift so the in-kernel normalize is one FMA per element.
    inv_n = 1.0 / jnp.float32(N)
    mean = hsum * inv_n
    var = jnp.maximum(hssq * inv_n - mean * mean, 0.0)      # biased batch variance
    scale = gamma.astype(jnp.float32) * lax.rsqrt(var + BN_EPS)
    shift = beta.astype(jnp.float32) - mean * scale

    w2_row = w2.reshape(1, Nh).astype(jnp.float32)          # (1, Nh)
    b2_s = b2.reshape(1).astype(jnp.float32)                # (1,) scalar -> SMEM

    # ---------------- Pass 2: normalize + layer 2 (independent/parallel axis) ----
    out = pl.pallas_call(
        _apply_kernel,
        out_shape=jax.ShapeDtypeStruct((1, N), jnp.float32),
        grid=grid,
        in_specs=[
            pl.BlockSpec((tn, D), lambda i: (i, 0)),
            pl.BlockSpec((D, Nh), lambda i: (0, 0)),
            pl.BlockSpec((1, Nh), lambda i: (0, 0)),
            pl.BlockSpec((1, Nh), lambda i: (0, 0)),
            pl.BlockSpec((1, Nh), lambda i: (0, 0)),
            pl.BlockSpec(memory_space=pltpu.MemorySpace.SMEM),
        ],
        out_specs=pl.BlockSpec((1, tn), lambda i: (0, i)),   # lane-dense output slab
        compiler_params=pltpu.CompilerParams(
            dimension_semantics=("parallel",),               # v7x: shard across 2 TCs
            vmem_limit_bytes=_VMEM_LIMIT_BYTES),
    )(x_mm, w1_mm, scale, shift, w2_row, b2_s)

    return out.reshape(N)


def _reference_forward(x, w1_t, b1, gamma, beta, w2, b2):
    """Pure-JAX mirror of the PyTorch module (train-mode BatchNorm1d)."""
    h = x @ w1_t + b1
    mean = jnp.mean(h, axis=0, keepdims=True)
    var = jnp.mean((h - mean) ** 2, axis=0, keepdims=True)
    h = (h - mean) / jnp.sqrt(var + BN_EPS) * gamma + beta
    h = jnp.maximum(h, 0.0)
    y = h @ w2 + b2
    return jax.nn.sigmoid(y).reshape(x.shape[0])


if __name__ == "__main__":
    # Small NNFBP-consistent sizes: N pixels, input vector length D, Nh hidden nodes.
    N, D, Nh = 1024, 128, 32

    key = jax.random.PRNGKey(0)
    kx, kw1, kb1, kg, kbe, kw2, kb2 = jax.random.split(key, 7)

    x = jax.random.normal(kx, (N, D), dtype=jnp.float32)

    # torch.nn.Linear default init: uniform(-1/sqrt(fan_in), 1/sqrt(fan_in)).
    bound1 = 1.0 / jnp.sqrt(jnp.float32(D))
    w1_t = jax.random.uniform(kw1, (D, Nh), jnp.float32, -bound1, bound1)
    b1 = jax.random.uniform(kb1, (1, Nh), jnp.float32, -bound1, bound1)

    # BatchNorm1d affine params (non-trivial values to exercise the fused scale/shift).
    gamma = jax.random.uniform(kg, (1, Nh), jnp.float32, 0.5, 1.5)
    beta = 0.1 * jax.random.normal(kbe, (1, Nh), dtype=jnp.float32)

    bound2 = 1.0 / jnp.sqrt(jnp.float32(Nh))
    w2 = jax.random.uniform(kw2, (Nh, 1), jnp.float32, -bound2, bound2)
    b2 = jax.random.uniform(kb2, (1, 1), jnp.float32, -bound2, bound2)

    ref = _reference_forward(x, w1_t, b1, gamma, beta, w2, b2)

    # f32 path (exact module semantics), forced multi-tile grid=(4,) to exercise the
    # stats accumulator and the parallel apply pass.
    out_f32 = jax.block_until_ready(
        nnfbp_forward(x, w1_t, b1, gamma, beta, w2, b2, block_n=256))
    assert out_f32.shape == (N,)
    assert jnp.allclose(out_f32, ref, atol=1e-5, rtol=1e-5), (
        f"f32 max abs diff {float(jnp.max(jnp.abs(out_f32 - ref)))}")

    # bf16 MXU-input path (perf configuration for v6e/v7x HBM roofline): looser check
    # since the module itself is f32.
    out_bf16 = jax.block_until_ready(
        nnfbp_forward(x, w1_t, b1, gamma, beta, w2, b2, matmul_dtype=jnp.bfloat16))
    assert out_bf16.shape == (N,)
    assert jnp.allclose(out_bf16, ref, atol=4e-2, rtol=4e-2), (
        f"bf16 max abs diff {float(jnp.max(jnp.abs(out_bf16 - ref)))}")

    print("KERNEL_OK")
</pallas_src>

<mosaic_0001>
module attributes {stable_mosaic.version = 11 : i64} {
  func.func @_stats_kernel(%arg0: i32, %arg1: memref<256x128xf32, #tpu.memory_space<vmem>>, %arg2: memref<128x32xf32, #tpu.memory_space<vmem>>, %arg3: memref<1x32xf32, #tpu.memory_space<vmem>>, %arg4: memref<1x32xf32, #tpu.memory_space<vmem>>) attributes {dimension_semantics = [#tpu.dimension_semantics<arbitrary>], iteration_bounds = array<i64: 4>, scalar_prefetch = 0 : i64, scratch_operands = 0 : i64, tpu.core_type = #tpu.core_type<tc>, window_params = [{transform_indices = @transform_0, window_bounds = array<i64: 256, 128>}, {pipeline_mode = #tpu.pipeline_mode<synchronous>, transform_indices = @transform_1, window_bounds = array<i64: 128, 32>}, {pipeline_mode = #tpu.pipeline_mode<synchronous>, transform_indices = @transform_2, window_bounds = array<i64: 1, 32>}, {pipeline_mode = #tpu.pipeline_mode<synchronous>, transform_indices = @transform_3, window_bounds = array<i64: 1, 32>}]} {
    %c0_i32 = arith.constant 0 : i32
    %0 = arith.cmpi eq, %arg0, %c0_i32 : i32
    %1 = arith.extui %0 : i1 to i32
    %c0_i32_0 = arith.constant 0 : i32
    %2 = arith.cmpi ne, %1, %c0_i32_0 : i32
    scf.if %2 {
      %cst_14 = arith.constant 0.000000e+00 : f32
      %17 = vector.broadcast %cst_14 : f32 to vector<1x32xf32>
      %c0_15 = arith.constant 0 : index
      %c0_16 = arith.constant 0 : index
      %18 = vector.load %arg3[%c0_15, %c0_16] : memref<1x32xf32, #tpu.memory_space<vmem>>, vector<1x32xf32>
      tpu.vector_store %arg3[%c0_15, %c0_16], %17 {strides = array<i32>} : memref<1x32xf32, #tpu.memory_space<vmem>>, vector<1x32xf32>,
      %cst_17 = arith.constant 0.000000e+00 : f32
      %19 = vector.broadcast %cst_17 : f32 to vector<1x32xf32>
      %c0_18 = arith.constant 0 : index
      %c0_19 = arith.constant 0 : index
      %20 = vector.load %arg4[%c0_18, %c0_19] : memref<1x32xf32, #tpu.memory_space<vmem>>, vector<1x32xf32>
      tpu.vector_store %arg4[%c0_18, %c0_19], %19 {strides = array<i32>} : memref<1x32xf32, #tpu.memory_space<vmem>>, vector<1x32xf32>,
    } else {
    }
    %c0 = arith.constant 0 : index
    %c0_1 = arith.constant 0 : index
    %3 = vector.load %arg1[%c0, %c0_1] : memref<256x128xf32, #tpu.memory_space<vmem>>, vector<256x128xf32>
    %c0_2 = arith.constant 0 : index
    %c0_3 = arith.constant 0 : index
    %4 = vector.load %arg2[%c0_2, %c0_3] : memref<128x32xf32, #tpu.memory_space<vmem>>, vector<128x32xf32>
    %cst = arith.constant dense<0.000000e+00> : vector<256x32xf32>
    %5 = tpu.matmul %3, %4, %cst {dimension_numbers = #tpu.dot_dimension_numbers<[1], [0], [0], [1], [0, 0, 1, 1], [], []>} : vector<256x128xf32>, vector<128x32xf32>, vector<256x32xf32> -> vector<256x32xf32>
    %c0_4 = arith.constant 0 : index
    %c0_5 = arith.constant 0 : index
    %6 = vector.load %arg3[%c0_4, %c0_5] : memref<1x32xf32, #tpu.memory_space<vmem>>, vector<1x32xf32>
    %cst_6 = arith.constant dense<0.000000e+00> : vector<32xf32>
    %7 = vector.multi_reduction <add>, %5, %cst_6 [0] : vector<256x32xf32> to vector<32xf32>
    %8 = vector.shape_cast %7 : vector<32xf32> to vector<1x32xf32>
    %9 = arith.addf %6, %8 : vector<1x32xf32>
    %c0_7 = arith.constant 0 : index
    %c0_8 = arith.constant 0 : index
    %10 = vector.load %arg3[%c0_7, %c0_8] : memref<1x32xf32, #tpu.memory_space<vmem>>, vector<1x32xf32>
    tpu.vector_store %arg3[%c0_7, %c0_8], %9 {strides = array<i32>} : memref<1x32xf32, #tpu.memory_space<vmem>>, vector<1x32xf32>,
    %c0_9 = arith.constant 0 : index
    %c0_10 = arith.constant 0 : index
    %11 = vector.load %arg4[%c0_9, %c0_10] : memref<1x32xf32, #tpu.memory_space<vmem>>, vector<1x32xf32>
    %12 = arith.mulf %5, %5 : vector<256x32xf32>
    %cst_11 = arith.constant dense<0.000000e+00> : vector<32xf32>
    %13 = vector.multi_reduction <add>, %12, %cst_11 [0] : vector<256x32xf32> to vector<32xf32>
    %14 = vector.shape_cast %13 : vector<32xf32> to vector<1x32xf32>
    %15 = arith.addf %11, %14 : vector<1x32xf32>
    %c0_12 = arith.constant 0 : index
    %c0_13 = arith.constant 0 : index
    %16 = vector.load %arg4[%c0_12, %c0_13] : memref<1x32xf32, #tpu.memory_space<vmem>>, vector<1x32xf32>
    tpu.vector_store %arg4[%c0_12, %c0_13], %15 {strides = array<i32>} : memref<1x32xf32, #tpu.memory_space<vmem>>, vector<1x32xf32>,
    return
  }
  func.func @transform_0(%arg0: i32) -> (i32, i32) {
    %c0_i32 = arith.constant 0 : i32
    %c0_i32_0 = arith.constant 0 : i32
    return %arg0, %c0_i32 : i32, i32
  }
  func.func @transform_1(%arg0: i32) -> (i32, i32) {
    %c0_i32 = arith.constant 0 : i32
    %c0_i32_0 = arith.constant 0 : i32
    %c0_i32_1 = arith.constant 0 : i32
    return %c0_i32, %c0_i32_0 : i32, i32
  }
  func.func @transform_2(%arg0: i32) -> (i32, i32) {
    %c0_i32 = arith.constant 0 : i32
    %c0_i32_0 = arith.constant 0 : i32
    %c0_i32_1 = arith.constant 0 : i32
    return %c0_i32, %c0_i32_0 : i32, i32
  }
  func.func @transform_3(%arg0: i32) -> (i32, i32) {
    %c0_i32 = arith.constant 0 : i32
    %c0_i32_0 = arith.constant 0 : i32
    %c0_i32_1 = arith.constant 0 : i32
    return %c0_i32, %c0_i32_0 : i32, i32
  }
}

</mosaic_0001>

<bundles_post_ra>
// kernel: tpu_custom_call.1
= control target key start
LH: loop header
LB: loop body
LE: loop exit
PB: predicated region body
PF: predicated region fallthrough
CT: control target
= control target key end

     0   :  { %9 = vsyncpa [#allocation3], 0  ;;  %s1499_s0 = inlined_call_operand.hbm [shape: f32[1024,128], index: 0, kind: input, shape index: {}]   ;;  %s1500_s1 = inlined_call_operand.vmem [shape: f32[128,32], index: 1, kind: input, shape index: {}]   ;;  %s1501_s2 = inlined_call_operand.hbm [shape: f32[1,32], index: 2, kind: output, shape index: {0}]   ;;  %s1502_s3 = inlined_call_operand.hbm [shape: f32[1,32], index: 3, kind: output, shape index: {1}]  }
   0x1   :  { %11 = vsyncpa [#allocation3 + $0x1], 0 }
   0x2   :  { %12 = vsyncpa [#allocation4], 0 }
   0x3   :  { %13 = vsyncpa [#allocation7], 0  ;;  %s1114_s12 = smov 0   ;;  %s1116_s13 = smov 0  }
   0x4   :  { %s1118_s14 = smov 0   ;;  %s1120_s15 = smov 0  }
   0x5 LB: > { %s1133_s16 = sadd.s32 4294967295, %s1086_s15   ;;  %s1136_s17 = sadd.s32 1, %s1086_s15   ;;  %s1086_s15 = sphi %s1120_s15, %s1509_s15   ;;  %s1082_s14 = sphi %s1118_s14, %s1508_s14   ;;  %s1078_s13 = sphi %s1116_s13, %s1507_s13   ;;  %s1074_s12 = sphi %s1114_s12, %s1506_s12  }
   0x6   : > { %s23_s18 = ssub.s32 %s1086_s15, %s1136_s17  ;;  %s26_s19 = sadd.s32 1, %s1082_s14 }
   0x7   : > { %p24_p0 = scmp.eq.s32.totalorder %s23_s18, 0  ;;  %p33_p1 = scmp.ne.s32.totalorder %s1082_s14, %s1078_s13 }
   0x8   : > { %p34_p2 = scmp.eq.s32.totalorder %s1086_s15, 0  ;;  %p39_p3 = scmp.ne.s32.totalorder %s1078_s13, %s1074_s12 }
   0x9   : > { %s1146_s20 = scalar_select %p24_p0, %s1082_s14, %s26_s19  }
   0xa   : > { %p35_p4 = por %p34_p2, %p33_p1  ;;  %p40_p5 = scmp.eq.s32.totalorder %s1133_s16, 0 }
   0xb   : > { %p920_p6 = scmp.lt.s32.totalorder %s1086_s15, 4  ;;  %s129_s22 = sand.u32 1, %s1082_s14  }
   0xc   : > { %p1150_p7 = por %p40_p5, %p39_p3  ;;  %s717_s23 = sshll.u32 %s129_s22, 8 }
   0xd   : > { %s729_s24 = sshll.u32 %s1086_s15, 12  ;;  %s133_s28 = scalar_lea.vmem [#allocation2], %s717_s23 }
   0xe   : > { %s1159_s27 = scalar_lea.hbm %s1499_s0, %s729_s24  ;;  %s140_s29 = sshll.u32 %s133_s28, 4  ;;  %s1161_s29 = int_to_ptr.vmem [resolvable:$true] %s140_s29 }
   0xf   : > { %p1163_p8 = pnand %p920_p6, %p35_p4  ;;  %s1168_s4 = scalar_lea.sflag [#allocation3], %s129_s22 }
  0x10   : > { %s962_s5 = scalar_lea.hbm %s1159_s27, 4096  ;;  %s967_s8 = scalar_lea.hbm %s1499_s0, 16384 }
  0x11   : > { %p963_p10 = scmp.ne.s32.totalorder %s1159_s27, %s962_s5  ;;  %p964_p11 = pneg %p1163_p8 }
  0x12   : > { %p968_p0 = scmp.lt.u32.totalorder %s1159_s27, %s1499_s0  ;;  %p969_p1 = scmp.lt.u32.totalorder %s967_s8, %s962_s5 }
  0x13   : > { %p965_p12 = pnand %p964_p11, %p963_p10  ;;  %p971_p3 = scmp.lt.u32.totalorder %s962_s5, %s1159_s27 }
  0x14   : > { %p970_p2 = por %p969_p1, %p968_p0 }
  0x15   : > { %p966_p13 = pneg %p965_p12 }
  0x16   : > { %p972_p4 = por %p971_p3, %p970_p2 }
  0x18   : > { %p973_p5 = pnand %p972_p4, %p966_p13 }
  0x1a   : > { %976 = shalt.err (!%p973_p5)
}
  0x1b   : > { %s977_s11 = scalar_lea.vmem %s1161_s29, 4096  ;;  %s1088_s12 = smov [#allocation2]  }
  0x1c   : > { %p978_p6 = scmp.ne.s32.totalorder %s1161_s29, %s977_s11  ;;  %s982_s18 = sshll.u32 %s1088_s12, 4  ;;  %s983_s18 = int_to_ptr.vmem [resolvable:$false] %s982_s18 }
  0x1d   : > { %s984_s19 = scalar_lea.vmem %s983_s18, 8192  ;;  %p985_p9 = scmp.lt.s32.totalorder %s1161_s29, %s983_s18 }
  0x1e   : > { %p980_p10 = pnand %p978_p6, %p964_p11  ;;  %p986_p0 = scmp.lt.s32.totalorder %s984_s19, %s977_s11 }
  0x20   : > { %p981_p12 = pneg %p980_p10  ;;  %p987_p1 = por %p986_p0, %p985_p9 }
  0x22   : > { %p988_p2 = pnand %p987_p1, %p981_p12 }
  0x24   : > { %991 = shalt.err (!%p988_p2)
}
  0x25   : > { %s1089_s22 = smov 128   ;;  %s1090_s23 = smov 8  }
  0x26   : > { %919 = dma.hbm_to_vmem [thread:$0]  (!%p1163_p8), %s1159_s27, 4096, %s1161_s29, %s1168_s4, %s1089_s22, %s1089_s22, %s1090_s23  }
  0x27   : > { %p148_p11 = scmp.lt.s32.totalorder %s1086_s15, 5  ;;  %p1505_p13 = scmp.ge.s32.totalorder %s1086_s15, 1 }
  0x29   : > { %p149_p3 = pnand %p1505_p13, %p148_p11 }
  0x2a   : > { %s154_s24 = sand.u32 (!%p149_p3), 1, %s1078_s13  }
  0x2b   : > { %152 = sbr.rel (%p149_p3) target bundleno = 425 (0x1a9), region = 28  ;;  %s721_s25 = sshll.u32 (!%p149_p3), %s154_s24, 8 }
  0x2c   : > { %s155_s26 = scalar_lea.sflag (!%p149_p3), [#allocation3], %s154_s24  ;;  %s1200_s28 = scalar_lea.vmem (!%p149_p3), [#allocation2], %s721_s25 }
  0x32   : > { %1061 = dma.done.wait (%p1150_p7), %s155_s26, 4096  }
  0x33   : > { %1063 = vsyncadd (%p1150_p7), %s155_s26, 4294963200  ;;  %p722_p9 = scmp.ne.s32.totalorder %s1133_s16, 0 }
  0x34   : > { %vm181_vm0 = vcmask (!%p722_p9), 253952   ;;  %v1091_v0 = vmov (!%p722_p9), 0.0  }
  0x35   : > { %180 = sbr.rel (%p722_p9) target bundleno = 60 (0x3c), region = 36  ;;  %182 = vst.msk [vmem:[#allocation5] sm:$0x1] (!%p722_p9), %vm181_vm0, %v1091_v0  ;;  %183 = vst.msk [vmem:[#allocation6] sm:$0x1] (!%p722_p9), %vm181_vm0, %v1091_v0 }
  0x3c PF: > { %v216_v1 = vld [vmem:[%s1500_s1] sm:$0xff]  ;;  %v217_v2 = vld [vmem:[%s1500_s1 + $0x8] sm:$0xff]  ;;  %v218_v3 = vld [vmem:[%s1500_s1 + $0x10] sm:$0xff]  ;;  %vm458_vm1 = vcmask 261120   ;;  %vm529_vm2 = vcmask 253952   ;;  %p921_p7 = scmp.eq.s32.totalorder %s1133_s16, 3 }
  0x3d   : > { %v858_v4 = vpack.c.bf16 %v217_v2, %v216_v1  ;;  %v219_v5 = vld [vmem:[%s1500_s1 + $0x18] sm:$0xff]  ;;  %v220_v7 = vld [vmem:[%s1500_s1 + $0x20] sm:$0xff]  ;;  %v221_v8 = vld [vmem:[%s1500_s1 + $0x28] sm:$0xff]  ;;  %s1093_s11 = smov [#allocation6]  }
  0x3e   : > { %v862_v6 = vpack.c.bf16 %v219_v5, %v218_v3  ;;  %v866_v9 = vpack.c.bf16 %v221_v8, %v220_v7  ;;  %v184_v10 = vld [vmem:[%s1200_s28] sm:$0xff]  ;;  %v222_v11 = vld [vmem:[%s1500_s1 + $0x30] sm:$0xff]  ;;  %v223_v12 = vld [vmem:[%s1500_s1 + $0x38] sm:$0xff]  ;;  %s653_s12 = sshll.u32 %s1093_s11, 4  ;;  %s1433_s12 = int_to_ptr.vmem [resolvable:$true] %s653_s12 }
  0x3f   : > { %859 = vmatprep.subr.bf16.mxu0 %v858_v4  ;;  %890 = vmatprep.subr.bf16.mxu1 %v858_v4  ;;  %v870_v13 = vpack.c.bf16 %v223_v12, %v222_v11  ;;  %v224_v14 = vld [vmem:[%s1500_s1 + $0x40] sm:$0xff]  ;;  %v225_v15 = vld [vmem:[%s1500_s1 + $0x48] sm:$0xff]  ;;  %v226_v18 = vld [vmem:[%s1500_s1 + $0x50] sm:$0xff] }
  0x40   : > { %861 = vmatpush3.bf16.msra.mxu0 %v858_v4  ;;  %898 = vmatpush3.bf16.msra.mxu1 %v858_v4  ;;  %v200_v16 = vld [vmem:[%s1200_s28 + $0x80] sm:$0xff]  ;;  %v874_v17 = vpack.c.bf16 %v225_v15, %v224_v14  ;;  %v227_v19 = vld [vmem:[%s1500_s1 + $0x58] sm:$0xff]  ;;  %v229_v22 = vld [vmem:[%s1500_s1 + $0x68] sm:$0xff] }
  0x41   : > { %863 = vmatprep.subr.bf16.mxu0 %v862_v6  ;;  %891 = vmatprep.subr.bf16.mxu1 %v862_v6  ;;  %v878_v20 = vpack.c.bf16 %v227_v19, %v226_v18  ;;  %v228_v21 = vld [vmem:[%s1500_s1 + $0x60] sm:$0xff]  ;;  %v230_v24 = vld [vmem:[%s1500_s1 + $0x70] sm:$0xff]  ;;  %v231_v25 = vld [vmem:[%s1500_s1 + $0x78] sm:$0xff] }
  0x42   : > { %810 = vmatprep.mubr.f32.mxu0 %v184_v10  ;;  %834 = vmatprep.mubr.f32.mxu1 %v200_v16  ;;  %v882_v23 = vpack.c.bf16 %v229_v22, %v228_v21  ;;  %v886_v26 = vpack.c.bf16 %v231_v25, %v230_v24  ;;  %v185_v27 = vld [vmem:[%s1200_s28 + $0x8] sm:$0xff]  ;;  %v186_v29 = vld [vmem:[%s1200_s28 + $0x10] sm:$0xff]  ;;  %v187_v31 = vld [vmem:[%s1200_s28 + $0x18] sm:$0xff] }
  0x43   : > { %v201_v28 = vld [vmem:[%s1200_s28 + $0x88] sm:$0xff]  ;;  %v202_v30 = vld [vmem:[%s1200_s28 + $0x90] sm:$0xff]  ;;  %v203_v32 = vld [vmem:[%s1200_s28 + $0x98] sm:$0xff] }
  0x44   : > { %865 = vmatpush3.bf16.msra.mxu0 %v862_v6  ;;  %899 = vmatpush3.bf16.msra.mxu1 %v862_v6  ;;  %v188_v33 = vld [vmem:[%s1200_s28 + $0x20] sm:$0xff]  ;;  %v189_v35 = vld [vmem:[%s1200_s28 + $0x28] sm:$0xff]  ;;  %v190_v37 = vld [vmem:[%s1200_s28 + $0x30] sm:$0xff] }
  0x45   : > { %867 = vmatprep.subr.bf16.mxu0 %v866_v9  ;;  %892 = vmatprep.subr.bf16.mxu1 %v866_v9  ;;  %v204_v34 = vld [vmem:[%s1200_s28 + $0xa0] sm:$0xff]  ;;  %v205_v36 = vld [vmem:[%s1200_s28 + $0xa8] sm:$0xff]  ;;  %v206_v38 = vld [vmem:[%s1200_s28 + $0xb0] sm:$0xff] }
  0x46   : > { %v191_v39 = vld [vmem:[%s1200_s28 + $0x38] sm:$0xff]  ;;  %v192_v41 = vld [vmem:[%s1200_s28 + $0x40] sm:$0xff]  ;;  %v193_v43 = vld [vmem:[%s1200_s28 + $0x48] sm:$0xff] }
  0x47   : > { %v207_v40 = vld [vmem:[%s1200_s28 + $0xb8] sm:$0xff]  ;;  %v208_v42 = vld [vmem:[%s1200_s28 + $0xc0] sm:$0xff]  ;;  %v209_v44 = vld [vmem:[%s1200_s28 + $0xc8] sm:$0xff] }
  0x48   : > { %869 = vmatpush3.bf16.msra.mxu0 %v866_v9  ;;  %900 = vmatpush3.bf16.msra.mxu1 %v866_v9  ;;  %v194_v45 = vld [vmem:[%s1200_s28 + $0x50] sm:$0xff]  ;;  %v195_v47 = vld [vmem:[%s1200_s28 + $0x58] sm:$0xff]  ;;  %v196_v49 = vld [vmem:[%s1200_s28 + $0x60] sm:$0xff] }
  0x49   : > { %871 = vmatprep.subr.bf16.mxu0 %v870_v13  ;;  %893 = vmatprep.subr.bf16.mxu1 %v870_v13  ;;  %v210_v46 = vld [vmem:[%s1200_s28 + $0xd0] sm:$0xff]  ;;  %v211_v48 = vld [vmem:[%s1200_s28 + $0xd8] sm:$0xff]  ;;  %v212_v50 = vld [vmem:[%s1200_s28 + $0xe0] sm:$0xff] }
  0x4a   : > { %v197_v51 = vld [vmem:[%s1200_s28 + $0x68] sm:$0xff]  ;;  %v198_v53 = vld [vmem:[%s1200_s28 + $0x70] sm:$0xff]  ;;  %v199_v55 = vld [vmem:[%s1200_s28 + $0x78] sm:$0xff] }
  0x4b   : > { %v213_v52 = vld [vmem:[%s1200_s28 + $0xe8] sm:$0xff]  ;;  %v214_v54 = vld [vmem:[%s1200_s28 + $0xf0] sm:$0xff]  ;;  %v215_v56 = vld [vmem:[%s1200_s28 + $0xf8] sm:$0xff]  ;;  %s1092_s28 = smov [#allocation5]  }
  0x4c   : > { %873 = vmatpush3.bf16.msra.mxu0 %v870_v13  ;;  %901 = vmatpush3.bf16.msra.mxu1 %v870_v13  ;;  %s642_s10 = sshll.u32 %s1092_s28, 4  ;;  %s643_s10 = int_to_ptr.vmem [resolvable:$true] %s642_s10 }
  0x4d   : > { %875 = vmatprep.subr.bf16.mxu0 %v874_v17  ;;  %894 = vmatprep.subr.bf16.mxu1 %v874_v17  ;;  %s992_s18 = scalar_lea.vmem %s643_s10, 16  ;;  %s998_s19 = scalar_lea.vmem %s643_s10, 32 }
  0x4e   : > { %p993_p8 = scmp.ne.s32.totalorder %s643_s10, %s992_s18  ;;  %p999_p6 = scmp.lt.s32.totalorder %s643_s10, %s643_s10 }
  0x4f   : > { %p1000_p10 = scmp.lt.s32.totalorder %s998_s19, %s992_s18 }
  0x50   : > { %877 = vmatpush3.bf16.msra.mxu0 %v874_v17  ;;  %902 = vmatpush3.bf16.msra.mxu1 %v874_v17  ;;  %p994_p4 = pnand %p993_p8, %p921_p7 }
  0x51   : > { %879 = vmatprep.subr.bf16.mxu0 %v878_v20  ;;  %895 = vmatprep.subr.bf16.mxu1 %v878_v20  ;;  %p1001_p12 = por %p1000_p10, %p999_p6 }
  0x52   : > { %p995_p5 = pneg %p994_p4 }
  0x54   : > { %881 = vmatpush3.bf16.msra.mxu0 %v878_v20  ;;  %903 = vmatpush3.bf16.msra.mxu1 %v878_v20  ;;  %p1002_p0 = pnand %p1001_p12, %p995_p5 }
  0x55   : > { %883 = vmatprep.subr.bf16.mxu0 %v882_v23  ;;  %896 = vmatprep.subr.bf16.mxu1 %v882_v23 }
  0x58   : > { %885 = vmatpush3.bf16.msra.mxu0 %v882_v23  ;;  %904 = vmatpush3.bf16.msra.mxu1 %v882_v23 }
  0x59   : > { %887 = vmatprep.subr.bf16.mxu0 %v886_v26  ;;  %897 = vmatprep.subr.bf16.mxu1 %v886_v26 }
  0x5c   : > { %889 = vmatpush3.bf16.msra.mxu0 %v886_v26  ;;  %905 = vmatpush3.bf16.msra.mxu1 %v886_v26 }
  0x5f   : > { %811 = vmatmul.mubr.f32.vlgmr.msra.gmra.mrb[0].mxu0 %v185_v27  ;;  %835 = vmatmul.mubr.f32.vlgmr.msra.gmra.mrb[0].mxu1 %v201_v28 }
  0x60   : > { %813 = vmatprep.mubr.f32.mxu0 %v186_v29  ;;  %837 = vmatprep.mubr.f32.mxu1 %v202_v30 }
  0x63   : > { %814 = vmatmul.mubr.f32.gmra.mrb[2].mxu0 %v187_v31  ;;  %838 = vmatmul.mubr.f32.gmra.mrb[2].mxu1 %v203_v32 }
  0x64   : > { %816 = vmatprep.mubr.f32.mxu0 %v188_v33  ;;  %840 = vmatprep.mubr.f32.mxu1 %v204_v34 }
  0x67   : > { %817 = vmatmul.mubr.f32.gmra.mrb[4].mxu0 %v189_v35  ;;  %841 = vmatmul.mubr.f32.gmra.mrb[4].mxu1 %v205_v36 }
  0x68   : > { %819 = vmatprep.mubr.f32.mxu0 %v190_v37  ;;  %843 = vmatprep.mubr.f32.mxu1 %v206_v38 }
  0x6b   : > { %820 = vmatmul.mubr.f32.gmra.mrb[6].mxu0 %v191_v39  ;;  %844 = vmatmul.mubr.f32.gmra.mrb[6].mxu1 %v207_v40 }
  0x6c   : > { %822 = vmatprep.mubr.f32.mxu0 %v192_v41  ;;  %846 = vmatprep.mubr.f32.mxu1 %v208_v42 }
  0x6f   : > { %823 = vmatmul.mubr.f32.gmra.mrb[8].mxu0 %v193_v43  ;;  %847 = vmatmul.mubr.f32.gmra.mrb[8].mxu1 %v209_v44 }
  0x70   : > { %825 = vmatprep.mubr.f32.mxu0 %v194_v45  ;;  %849 = vmatprep.mubr.f32.mxu1 %v210_v46 }
  0x73   : > { %826 = vmatmul.mubr.f32.gmra.mrb[10].mxu0 %v195_v47  ;;  %850 = vmatmul.mubr.f32.gmra.mrb[10].mxu1 %v211_v48 }
  0x74   : > { %828 = vmatprep.mubr.f32.mxu0 %v196_v49  ;;  %852 = vmatprep.mubr.f32.mxu1 %v212_v50 }
  0x77   : > { %829 = vmatmul.mubr.f32.gmra.mrb[12].mxu0 %v197_v51  ;;  %853 = vmatmul.mubr.f32.gmra.mrb[12].mxu1 %v213_v52 }
  0x78   : > { %831 = vmatprep.mubr.f32.mxu0 %v198_v53  ;;  %855 = vmatprep.mubr.f32.mxu1 %v214_v54 }
  0x7b   : > { %832 = vmatmul.mubr.f32.gmra.mrb[14].mxu0 %v199_v55  ;;  %856 = vmatmul.mubr.f32.gmra.mrb[14].mxu1 %v215_v56 }
 0x132   : > { %v812_v57 = vpop.f32.mrb[0].mxu0  ;;  %v1287_v58 = vpop.f32.mrb[0].mxu1 }
 0x133   : > { %v460_v59 = vsel %vm458_vm1, %v812_v57, 0.0  ;;  %v533_v60 = vmul.f32 %v812_v57, %v812_v57  ;;  %v298_v61 = vpop.f32.mrb[1].mxu0  ;;  %v1290_v62 = vpop.f32.mrb[1].mxu1 }
 0x134   : > { %v459_v63 = vsel %vm458_vm1, %v298_v61, 0.0  ;;  %v532_v0 = vmul.f32 %v298_v61, %v298_v61 }
 0x135   : > { %v565_v1 = vsel %vm458_vm1, %v533_v60, 0.0  ;;  %v461_v2 = vadd.f32 %v460_v59, %v459_v63 }
 0x136   : > { %v564_v3 = vsel %vm458_vm1, %v532_v0, 0.0  ;;  %v815_v4 = vpop.f32.mrb[2].mxu0  ;;  %v1295_v5 = vpop.f32.mrb[2].mxu1 }
 0x137   : > { %v566_v6 = vadd.f32 %v565_v1, %v564_v3  ;;  %v308_v7 = vpop.f32.mrb[3].mxu0  ;;  %v1297_v8 = vpop.f32.mrb[3].mxu1  ;;  %v535_v9 = vmul.f32 %v815_v4, %v815_v4  ;;  %v464_v13 = vsel %vm458_vm1, %v815_v4, 0.0 }
 0x138   : > { %v462_v10 = vsel %vm458_vm1, %v308_v7, 0.0  ;;  %v534_v11 = vmul.f32 %v308_v7, %v308_v7 }
 0x139   : > { %v463_v12 = vadd.f32 %v462_v10, %v461_v2  ;;  %v569_v21 = vsel %vm458_vm1, %v535_v9, 0.0 }
 0x13a   : > { %v567_v14 = vsel %vm458_vm1, %v534_v11, 0.0  ;;  %v818_v15 = vpop.f32.mrb[4].mxu0  ;;  %v1302_v16 = vpop.f32.mrb[4].mxu1 }
 0x13b   : > { %v568_v17 = vadd.f32 %v567_v14, %v566_v6  ;;  %v318_v18 = vpop.f32.mrb[5].mxu0  ;;  %v465_v19 = vadd.f32 %v464_v13, %v463_v12  ;;  %v1304_v20 = vpop.f32.mrb[5].mxu1  ;;  %v537_v22 = vmul.f32 %v818_v15, %v818_v15  ;;  %v468_v27 = vsel %vm458_vm1, %v818_v15, 0.0 }
 0x13c   : > { %v466_v23 = vsel %vm458_vm1, %v318_v18, 0.0  ;;  %v536_v24 = vmul.f32 %v318_v18, %v318_v18 }
 0x13d   : > { %v467_v25 = vadd.f32 %v466_v23, %v465_v19  ;;  %v570_v26 = vadd.f32 %v569_v21, %v568_v17  ;;  %v573_v35 = vsel %vm458_vm1, %v537_v22, 0.0 }
 0x13e   : > { %v571_v28 = vsel %vm458_vm1, %v536_v24, 0.0  ;;  %v821_v29 = vpop.f32.mrb[6].mxu0  ;;  %v1310_v30 = vpop.f32.mrb[6].mxu1 }
 0x13f   : > { %v572_v31 = vadd.f32 %v571_v28, %v570_v26  ;;  %v328_v32 = vpop.f32.mrb[7].mxu0  ;;  %v469_v33 = vadd.f32 %v468_v27, %v467_v25  ;;  %v1312_v34 = vpop.f32.mrb[7].mxu1  ;;  %v539_v36 = vmul.f32 %v821_v29, %v821_v29  ;;  %v472_v41 = vsel %vm458_vm1, %v821_v29, 0.0 }
 0x140   : > { %v470_v37 = vsel %vm458_vm1, %v328_v32, 0.0  ;;  %v538_v38 = vmul.f32 %v328_v32, %v328_v32 }
 0x141   : > { %v471_v39 = vadd.f32 %v470_v37, %v469_v33  ;;  %v574_v40 = vadd.f32 %v573_v35, %v572_v31  ;;  %v577_v49 = vsel %vm458_vm1, %v539_v36, 0.0  ;;  %v548_v33 = vmul.f32 %v1290_v62, %v1290_v62 }
 0x142   : > { %v575_v42 = vsel %vm458_vm1, %v538_v38, 0.0  ;;  %v824_v43 = vpop.f32.mrb[8].mxu0  ;;  %v1318_v44 = vpop.f32.mrb[8].mxu1 }
 0x143   : > { %v576_v45 = vadd.f32 %v575_v42, %v574_v40  ;;  %v338_v46 = vpop.f32.mrb[9].mxu0  ;;  %v473_v47 = vadd.f32 %v472_v41, %v471_v39  ;;  %v1320_v48 = vpop.f32.mrb[9].mxu1  ;;  %v541_v50 = vmul.f32 %v824_v43, %v824_v43  ;;  %v476_v55 = vsel %vm458_vm1, %v824_v43, 0.0 }
 0x144   : > { %v474_v51 = vsel %vm458_vm1, %v338_v46, 0.0  ;;  %v540_v52 = vmul.f32 %v338_v46, %v338_v46 }
 0x145   : > { %v475_v53 = vadd.f32 %v474_v51, %v473_v47  ;;  %v578_v54 = vadd.f32 %v577_v49, %v576_v45  ;;  %v581_v1 = vsel %vm458_vm1, %v541_v50, 0.0  ;;  %v490_v45 = vsel %vm458_vm1, %v1290_v62, 0.0 }
 0x146   : > { %v579_v56 = vsel %vm458_vm1, %v540_v52, 0.0  ;;  %v827_v57 = vpop.f32.mrb[10].mxu0  ;;  %v1326_v59 = vpop.f32.mrb[10].mxu1  ;;  %v549_v50 = vmul.f32 %v1287_v58, %v1287_v58  ;;  %v595_v51 = vsel %vm458_vm1, %v548_v33, 0.0  ;;  %v550_v52 = vmul.f32 %v1297_v8, %v1297_v8 }
 0x147   : > { %v580_v60 = vadd.f32 %v579_v56, %v578_v54  ;;  %v348_v61 = vpop.f32.mrb[11].mxu0  ;;  %v477_v63 = vadd.f32 %v476_v55, %v475_v53  ;;  %v1328_v0 = vpop.f32.mrb[11].mxu1  ;;  %v543_v2 = vmul.f32 %v827_v57, %v827_v57  ;;  %v480_v9 = vsel %vm458_vm1, %v827_v57, 0.0 }
 0x148   : > { %v478_v3 = vsel %vm458_vm1, %v348_v61, 0.0  ;;  %v542_v4 = vmul.f32 %v348_v61, %v348_v61  ;;  %v492_v55 = vsel %vm458_vm1, %v1287_v58, 0.0  ;;  %v494_v62 = vsel %vm458_vm1, %v1297_v8, 0.0 }
 0x149   : > { %v479_v6 = vadd.f32 %v478_v3, %v477_v63  ;;  %v582_v7 = vadd.f32 %v581_v1, %v580_v60  ;;  %v585_v18 = vsel %vm458_vm1, %v543_v2, 0.0  ;;  %v597_v60 = vsel %vm458_vm1, %v549_v50, 0.0 }
 0x14a   : > { %v583_v10 = vsel %vm458_vm1, %v542_v4, 0.0  ;;  %v830_v11 = vpop.f32.mrb[12].mxu0  ;;  %v1334_v12 = vpop.f32.mrb[12].mxu1  ;;  %v551_v61 = vmul.f32 %v1295_v5, %v1295_v5  ;;  %v599_v63 = vsel %vm458_vm1, %v550_v52, 0.0  ;;  %v552_v1 = vmul.f32 %v1304_v20, %v1304_v20 }
 0x14b   : > { %v584_v13 = vadd.f32 %v583_v10, %v582_v7  ;;  %v358_v14 = vpop.f32.mrb[13].mxu0  ;;  %v481_v15 = vadd.f32 %v480_v9, %v479_v6  ;;  %v1336_v17 = vpop.f32.mrb[13].mxu1  ;;  %v545_v19 = vmul.f32 %v830_v11, %v830_v11  ;;  %v484_v25 = vsel %vm458_vm1, %v830_v11, 0.0 }
 0x14c   : > { %v482_v21 = vsel %vm458_vm1, %v358_v14, 0.0  ;;  %v544_v22 = vmul.f32 %v358_v14, %v358_v14  ;;  %v496_v58 = vsel %vm458_vm1, %v1295_v5, 0.0  ;;  %v498_v8 = vsel %vm458_vm1, %v1304_v20, 0.0 }
 0x14d   : > { %v483_v23 = vadd.f32 %v482_v21, %v481_v15  ;;  %v586_v24 = vadd.f32 %v585_v18, %v584_v13  ;;  %v589_v36 = vsel %vm458_vm1, %v545_v19, 0.0  ;;  %v601_v7 = vsel %vm458_vm1, %v551_v61, 0.0 }
 0x14e   : > { %v587_v26 = vsel %vm458_vm1, %v544_v22, 0.0  ;;  %v833_v27 = vpop.f32.mrb[14].mxu0  ;;  %v1342_v28 = vpop.f32.mrb[14].mxu1  ;;  %v553_v9 = vmul.f32 %v1302_v16, %v1302_v16  ;;  %v603_v10 = vsel %vm458_vm1, %v552_v1, 0.0  ;;  %v554_v11 = vmul.f32 %v1312_v34, %v1312_v34 }
 0x14f   : > { %v588_v29 = vadd.f32 %v587_v26, %v586_v24  ;;  %v368_v31 = vpop.f32.mrb[15].mxu0  ;;  %v485_v32 = vadd.f32 %v484_v25, %v483_v23  ;;  %v1346_v35 = vpop.f32.mrb[15].mxu1  ;;  %v547_v37 = vmul.f32 %v833_v27, %v833_v27  ;;  %v488_v42 = vsel %vm458_vm1, %v833_v27, 0.0 }
 0x150   : > { %v486_v38 = vsel %vm458_vm1, %v368_v31, 0.0  ;;  %v546_v39 = vmul.f32 %v368_v31, %v368_v31  ;;  %v500_v5 = vsel %vm458_vm1, %v1302_v16, 0.0  ;;  %v502_v20 = vsel %vm458_vm1, %v1312_v34, 0.0 }
 0x151   : > { %v487_v40 = vadd.f32 %v486_v38, %v485_v32  ;;  %v590_v41 = vadd.f32 %v589_v36, %v588_v29  ;;  %v593_v49 = vsel %vm458_vm1, %v547_v37, 0.0  ;;  %v605_v19 = vsel %vm458_vm1, %v553_v9, 0.0 }
 0x152   : > { %v591_v43 = vsel %vm458_vm1, %v546_v39, 0.0  ;;  %v555_v21 = vmul.f32 %v1310_v30, %v1310_v30  ;;  %v607_v22 = vsel %vm458_vm1, %v554_v11, 0.0  ;;  %v556_v23 = vmul.f32 %v1320_v48, %v1320_v48 }
 0x153   : > { %v489_v46 = vadd.f32 %v488_v42, %v487_v40  ;;  %v592_v47 = vadd.f32 %v591_v43, %v590_v41  ;;  %v504_v16 = vsel %vm458_vm1, %v1310_v30, 0.0  ;;  %v506_v34 = vsel %vm458_vm1, %v1320_v48, 0.0 }
 0x154   : > { %v609_v29 = vsel %vm458_vm1, %v555_v21, 0.0  ;;  %v557_v31 = vmul.f32 %v1318_v44, %v1318_v44  ;;  %v611_v32 = vsel %vm458_vm1, %v556_v23, 0.0  ;;  %v558_v33 = vmul.f32 %v1328_v0, %v1328_v0 }
 0x155   : > { %v594_v53 = vadd.f32 %v593_v49, %v592_v47  ;;  %v491_v54 = vadd.f32 %v490_v45, %v489_v46  ;;  %v508_v30 = vsel %vm458_vm1, %v1318_v44, 0.0  ;;  %v510_v48 = vsel %vm458_vm1, %v1328_v0, 0.0 }
 0x156   : > { %v613_v40 = vsel %vm458_vm1, %v557_v31, 0.0  ;;  %v559_v41 = vmul.f32 %v1326_v59, %v1326_v59  ;;  %v615_v42 = vsel %vm458_vm1, %v558_v33, 0.0  ;;  %v560_v43 = vmul.f32 %v1336_v17, %v1336_v17 }
 0x157   : > { %v596_v56 = vadd.f32 %v595_v51, %v594_v53  ;;  %v493_v57 = vadd.f32 %v492_v55, %v491_v54  ;;  %v512_v44 = vsel %vm458_vm1, %v1326_v59, 0.0  ;;  %v514_v0 = vsel %vm458_vm1, %v1336_v17, 0.0 }
 0x158   : > { %v617_v50 = vsel %vm458_vm1, %v559_v41, 0.0  ;;  %v561_v51 = vmul.f32 %v1334_v12, %v1334_v12  ;;  %v619_v52 = vsel %vm458_vm1, %v560_v43, 0.0  ;;  %v562_v53 = vmul.f32 %v1346_v35, %v1346_v35 }
 0x159   : > { %v495_v2 = vadd.f32 %v494_v62, %v493_v57  ;;  %v598_v3 = vadd.f32 %v597_v60, %v596_v56  ;;  %v516_v59 = vsel %vm458_vm1, %v1334_v12, 0.0  ;;  %v518_v17 = vsel %vm458_vm1, %v1346_v35, 0.0 }
 0x15a   : > { %v621_v57 = vsel %vm458_vm1, %v561_v51, 0.0  ;;  %v563_v60 = vmul.f32 %v1342_v28, %v1342_v28  ;;  %v623_v61 = vsel %vm458_vm1, %v562_v53, 0.0 }
 0x15b   : > { %v600_v4 = vadd.f32 %v599_v63, %v598_v3  ;;  %v497_v6 = vadd.f32 %v496_v58, %v495_v2  ;;  %v520_v2 = vsel %vm458_vm1, %v1342_v28, 0.0 }
 0x15c   : > { %v625_v12 = vsel %vm458_vm1, %v563_v60, 0.0 }
 0x15d   : > { %v499_v13 = vadd.f32 %v498_v8, %v497_v6  ;;  %v602_v14 = vadd.f32 %v601_v7, %v600_v4 }
 0x15f   : > { %v604_v15 = vadd.f32 %v603_v10, %v602_v14  ;;  %v501_v18 = vadd.f32 %v500_v5, %v499_v13  ;;  %v457_v5 = vld [vmem:[#allocation5] sm:$0x1] }
 0x161   : > { %v503_v24 = vadd.f32 %v502_v20, %v501_v18  ;;  %v606_v25 = vadd.f32 %v605_v19, %v604_v15  ;;  %v531_v15 = vld [vmem:[#allocation6] sm:$0x1] }
 0x163   : > { %v608_v26 = vadd.f32 %v607_v22, %v606_v25  ;;  %v505_v27 = vadd.f32 %v504_v16, %v503_v24 }
 0x165   : > { %v507_v36 = vadd.f32 %v506_v34, %v505_v27  ;;  %v610_v37 = vadd.f32 %v609_v29, %v608_v26 }
 0x167   : > { %v612_v38 = vadd.f32 %v611_v32, %v610_v37  ;;  %v509_v39 = vadd.f32 %v508_v30, %v507_v36 }
 0x169   : > { %v511_v45 = vadd.f32 %v510_v48, %v509_v39  ;;  %v614_v46 = vadd.f32 %v613_v40, %v612_v38 }
 0x16b   : > { %v616_v47 = vadd.f32 %v615_v42, %v614_v46  ;;  %v513_v49 = vadd.f32 %v512_v44, %v511_v45 }
 0x16d   : > { %v515_v54 = vadd.f32 %v514_v0, %v513_v49  ;;  %v618_v55 = vadd.f32 %v617_v50, %v616_v47 }
 0x16f   : > { %v620_v62 = vadd.f32 %v619_v52, %v618_v55  ;;  %v517_v56 = vadd.f32 %v516_v59, %v515_v54 }
 0x171   : > { %v519_v63 = vadd.f32 %v518_v17, %v517_v56  ;;  %v622_v1 = vadd.f32 %v621_v57, %v620_v62 }
 0x173   : > { %v521_v3 = vadd.f32 %v520_v2, %v519_v63  ;;  %v624_v58 = vadd.f32 %v623_v61, %v622_v1 }
 0x175   : > { %v522_v8 = vrot.slane %v521_v3, 4  ;;  %v626_v35 = vadd.f32 %v625_v12, %v624_v58 }
 0x177   : > { %v523_v4 = vadd.f32 %v522_v8, %v521_v3  ;;  %v627_v6 = vrot.slane %v626_v35, 4 }
 0x179   : > { %v524_v7 = vrot.slane %v523_v4, 2  ;;  %v628_v9 = vadd.f32 %v627_v6, %v626_v35 }
 0x17b   : > { %v525_v10 = vadd.f32 %v524_v7, %v523_v4  ;;  %v629_v11 = vrot.slane %v628_v9, 2 }
 0x17d   : > { %v526_v13 = vrot.slane %v525_v10, 1  ;;  %v630_v14 = vadd.f32 %v629_v11, %v628_v9 }
 0x17f   : > { %v527_v28 = vadd.f32 %v526_v13, %v525_v10  ;;  %v631_v20 = vrot.slane %v630_v14, 1 }
 0x181   : > { %v528_v18 = vadd.f32 %v527_v28, %v457_v5  ;;  %v632_v19 = vadd.f32 %v631_v20, %v630_v14 }
 0x183   : > { %530 = vst.msk [vmem:[#allocation5] sm:$0x1] %vm529_vm2, %v528_v18  ;;  %v633_v21 = vadd.f32 %v632_v19, %v531_v15 }
 0x184   : > { %1005 = shalt.err (!%p1002_p0)
}
 0x185   : > { %s1006_s24 = scalar_lea.hbm %s1501_s2, 16 }
 0x186   : > { %p1007_p1 = scmp.ne.s32.totalorder %s1501_s2, %s1006_s24  ;;  %p1012_p13 = scmp.lt.u32.totalorder %s1006_s24, %s1501_s2 }
 0x188   : > { %p1008_p2 = pnand %p1007_p1, %p921_p7 }
 0x18a   : > { %p1009_p11 = pneg %p1008_p2 }
 0x18c   : > { %p1014_p3 = pnand %p1012_p13, %p1009_p11 }
 0x18e   : > { %1017 = shalt.err (!%p1014_p3)
}
 0x18f   : > { %909 = dma.vmem_to_hbm [thread:$0]  (%p921_p7), %s643_s10, 16, %s1501_s2, [#allocation4]   ;;  %634 = vst.msk [vmem:[#allocation6] sm:$0x1] %vm529_vm2, %v633_v21 }
 0x190   : > { %s1018_s4 = scalar_lea.vmem %s1433_s12, 16  ;;  %s1024_s21 = scalar_lea.vmem %s1433_s12, 32 }
 0x191   : > { %p1019_p9 = scmp.ne.s32.totalorder %s1433_s12, %s1018_s4  ;;  %p1025_p5 = scmp.lt.s32.totalorder %s1433_s12, %s1433_s12 }
 0x192   : > { %p1026_p6 = scmp.lt.s32.totalorder %s1024_s21, %s1018_s4 }
 0x193   : > { %p1020_p8 = pnand %p1019_p9, %p921_p7 }
 0x194   : > { %p1027_p10 = por %p1026_p6, %p1025_p5 }
 0x195   : > { %p1021_p4 = pneg %p1020_p8 }
 0x197   : > { %p1028_p12 = pnand %p1027_p10, %p1021_p4 }
 0x199   : > { %1031 = shalt.err (!%p1028_p12)
}
 0x19a   : > { %s1032_s7 = scalar_lea.hbm %s1502_s3, 16 }
 0x19b   : > { %p1033_p0 = scmp.ne.s32.totalorder %s1502_s3, %s1032_s7  ;;  %p1038_p11 = scmp.lt.u32.totalorder %s1032_s7, %s1502_s3 }
 0x19d   : > { %p1034_p1 = pnand %p1033_p0, %p921_p7 }
 0x19f   : > { %p1035_p2 = pneg %p1034_p1 }
 0x1a1   : > { %p1040_p13 = pnand %p1038_p11, %p1035_p2 }
 0x1a3   : > { %1043 = shalt.err (!%p1040_p13)
}
 0x1a4   : > { %911 = dma.vmem_to_hbm [thread:$0]  (%p921_p7), %s1433_s12, 16, %s1502_s3, [#allocation7]  }
 0x1a5   : > { %1065 = dma.done.wait (%p921_p7), [#allocation4], 16  }
 0x1a6   : > { %1067 = vsyncadd (%p921_p7), [#allocation4], 4294967280 }
 0x1a7   : > { %1069 = dma.done.wait (%p921_p7), [#allocation7], 16  }
 0x1a8   : > { %1071 = vsyncadd (%p921_p7), [#allocation7], 4294967280 }
 0x1a9 PF: > { %p16_p3 = scmp.ge.s32.totalorder %s1136_s17, 6   ;;  %s1506_s12 = smov %s1078_s13 }
 0x1aa   : > { %s1507_s13 = smov %s1082_s14  ;;  %s1508_s14 = smov %s1146_s20 }
 0x1ab   : > { %s1509_s15 = smov %s1136_s17  ;;  %18 = sbr.rel (!%p16_p3) target bundleno = 5 (0x5), region = 77 }
 0x1b2   :  { %670 = vsyncpa [#allocation3], 1 }
 0x1b3   :  { %672 = vsyncpa [#allocation3 + $0x1], 1 }
 0x1b4   :  { %673 = vsyncpa [#allocation4], 1 }
 0x1b5   :  { %675 = vsyncpa [#allocation4 + $0x1], 1 }
 0x1b6   :  { %676 = vsyncpa [#allocation7], 1 }

</bundles_post_ra>
